<compile_context>
chip_gen: v6e
topology: v6e:2x2x1
jax: 0.10.0
libtpu: 0.0.40
codegen_flags: <defaults>
</compile_context>

<pallas_src>
import functools
import math

import jax
import jax.numpy as jnp
from jax.experimental import pallas as pl
from jax.experimental.pallas import tpu as pltpu

HIDDEN = 16   # padded hidden width (>= 12, multiple of 8)
OUT = 3       # fc3 output width

# Weight-slab row layout (all fixed offsets 8-aligned):
_W2_OFF = 0        # fc2 weight  : rows [0, 16)
_W3_OFF = 16       # fc3 weight  : rows [16, 32)
_B_OFF = 32        # biases      : row 32 = b1, 33 = b2, 34 = b3 (35..39 zero)
_W1_OFF = 40       # fc1 weight  : rows [40, 40 + in_size)


def _round_up(v, m):
    return (v + m - 1) // m * m


def _cdiv(a, b):
    return (a + b - 1) // b


def fcn_kernel(x_ref, w_ref, out_ref, *, in_size):
    """One batch tile of the full 3-layer MLP.

    Padded weight columns and bias lanes are exact zeros, so ReLU(0)=0
    propagates zeros through the padded lanes; output columns 3..15 are 0.
    """
    x = x_ref[...]                                    # (tb, in_size) f32

    b1 = w_ref[_B_OFF + 0:_B_OFF + 1, :]              # (1, 16)
    b2 = w_ref[_B_OFF + 1:_B_OFF + 2, :]
    b3 = w_ref[_B_OFF + 2:_B_OFF + 3, :]

    h = jnp.dot(x, w_ref[_W1_OFF:_W1_OFF + in_size, :],
                preferred_element_type=jnp.float32) + b1
    h = jnp.maximum(h, 0.0)

    h = jnp.dot(h, w_ref[_W2_OFF:_W2_OFF + HIDDEN, :],
                preferred_element_type=jnp.float32) + b2
    h = jnp.maximum(h, 0.0)

    y = jnp.dot(h, w_ref[_W3_OFF:_W3_OFF + HIDDEN, :],
                preferred_element_type=jnp.float32) + b3

    out_ref[...] = y                                  # (tb, 16); cols 3..15 == 0


def init_params(key, row_num, col_num):
    """PyTorch-style init: U(-1/sqrt(fan_in), 1/sqrt(fan_in)); W transposed."""
    in_size = row_num * col_num
    dims = [(in_size, 12), (12, 6), (6, 3)]
    params = []
    for fan_in, fan_out in dims:
        key, kw, kb = jax.random.split(key, 3)
        bound = 1.0 / math.sqrt(fan_in)
        w = jax.random.uniform(kw, (fan_in, fan_out), jnp.float32, -bound, bound)
        b = jax.random.uniform(kb, (fan_out,), jnp.float32, -bound, bound)
        params.append((w, b))
    return params


def pack_params(params, in_size):
    """Pack the 3 (W, b) pairs into ONE zero-padded weight slab."""
    (w1, b1), (w2, b2), (w3, b3) = params
    slab = jnp.zeros((_W1_OFF + in_size, HIDDEN), jnp.float32)
    slab = slab.at[_W2_OFF:_W2_OFF + 12, 0:6].set(w2)
    slab = slab.at[_W3_OFF:_W3_OFF + 6, 0:3].set(w3)
    slab = slab.at[_B_OFF + 0, 0:12].set(b1)
    slab = slab.at[_B_OFF + 1, 0:6].set(b2)
    slab = slab.at[_B_OFF + 2, 0:3].set(b3)
    slab = slab.at[_W1_OFF:_W1_OFF + in_size, 0:12].set(w1)
    return slab


def _choose_batch_tile(n, in_size):
    """Pick the batch tile: big (overhead amortized) but VMEM-safe, >=2 steps
    for larger batches so both v7x TensorCores get work."""
    row_bytes = 4 * (in_size + HIDDEN)            # x row + out row, f32
    tb_cap = (10 << 20) // (2 * row_bytes)        # ~10 MiB double-buffer budget
    tb_cap = max(8, min(2048, tb_cap) // 8 * 8)
    n8 = _round_up(n, 8)
    if n8 <= tb_cap:
        if n8 > 256:
            # Split into (at least) 2 tiles so the "parallel" grid axis can
            # shard across both TensorCores on v7x.
            return min(tb_cap, _round_up(_cdiv(n8, 2), 8))
        return n8
    return tb_cap


@jax.jit
def fcn_forward(x, w_slab):
    """x: (N, rows, cols) float32. Returns (N, 3) float32."""
    n = x.shape[0]
    x2 = x.reshape(n, -1)                         # free reshape, no pad copies
    in_size = x2.shape[1]
    assert w_slab.shape == (_W1_OFF + in_size, HIDDEN)

    tb = _choose_batch_tile(n, in_size)
    grid = _cdiv(n, tb)                           # trailing tile may overrun n;
                                                  # those rows are masked/sliced

    kernel = functools.partial(fcn_kernel, in_size=in_size)
    out = pl.pallas_call(
        kernel,
        out_shape=jax.ShapeDtypeStruct((n, HIDDEN), jnp.float32),
        grid=(grid,),
        in_specs=[
            pl.BlockSpec((tb, in_size), lambda i: (i, 0)),
            pl.BlockSpec(w_slab.shape, lambda i: (0, 0)),
        ],
        out_specs=pl.BlockSpec((tb, HIDDEN), lambda i: (i, 0)),
        compiler_params=pltpu.CompilerParams(
            dimension_semantics=("parallel",)),
    )(x2, w_slab)
    return out[:, :OUT]


def reference_forward(x, params):
    (w1, b1), (w2, b2), (w3, b3) = params
    h = x.reshape(x.shape[0], -1)
    h = jnp.maximum(h @ w1 + b1, 0.0)
    h = jnp.maximum(h @ w2 + b2, 0.0)
    return h @ w3 + b3


if __name__ == "__main__":
    row_num, col_num = 16, 16     # in_size = 256

    key = jax.random.PRNGKey(0)
    k_params, k_x = jax.random.split(key)

    params = init_params(k_params, row_num, col_num)
    w_slab = pack_params(params, row_num * col_num)

    for batch in (16, 13):        # aligned and ragged (overrunning last tile)
        k_x, k_use = jax.random.split(k_x)
        x = jax.random.normal(k_use, (batch, row_num, col_num), jnp.float32)

        y = fcn_forward(x, w_slab)
        jax.block_until_ready(y)

        y_ref = reference_forward(x, params)
        assert y.shape == (batch, OUT)
        assert jnp.allclose(y, y_ref, atol=1e-5, rtol=1e-5)

    print("KERNEL_OK")
</pallas_src>

<mosaic_0001>
module attributes {stable_mosaic.version = 11 : i64} {
  func.func @fcn_kernel(%arg0: i32, %arg1: memref<16x256xf32, #tpu.memory_space<vmem>>, %arg2: memref<296x16xf32, #tpu.memory_space<vmem>>, %arg3: memref<16x16xf32, #tpu.memory_space<vmem>>) attributes {dimension_semantics = [#tpu.dimension_semantics<parallel>], iteration_bounds = array<i64: 1>, scalar_prefetch = 0 : i64, scratch_operands = 0 : i64, tpu.core_type = #tpu.core_type<tc>, window_params = [{transform_indices = @transform_0, window_bounds = array<i64: 16, 256>}, {pipeline_mode = #tpu.pipeline_mode<synchronous>, transform_indices = @transform_1, window_bounds = array<i64: 296, 16>}, {transform_indices = @transform_2, window_bounds = array<i64: 16, 16>}]} {
    %c0 = arith.constant 0 : index
    %c0_0 = arith.constant 0 : index
    %0 = vector.load %arg1[%c0, %c0_0] : memref<16x256xf32, #tpu.memory_space<vmem>>, vector<16x256xf32>
    %c32 = arith.constant 32 : index
    %c0_1 = arith.constant 0 : index
    %1 = vector.load %arg2[%c32, %c0_1] : memref<296x16xf32, #tpu.memory_space<vmem>>, vector<1x16xf32>
    %c33 = arith.constant 33 : index
    %c0_2 = arith.constant 0 : index
    %2 = vector.load %arg2[%c33, %c0_2] : memref<296x16xf32, #tpu.memory_space<vmem>>, vector<1x16xf32>
    %c34 = arith.constant 34 : index
    %c0_3 = arith.constant 0 : index
    %3 = vector.load %arg2[%c34, %c0_3] : memref<296x16xf32, #tpu.memory_space<vmem>>, vector<1x16xf32>
    %c40 = arith.constant 40 : index
    %c0_4 = arith.constant 0 : index
    %4 = vector.load %arg2[%c40, %c0_4] : memref<296x16xf32, #tpu.memory_space<vmem>>, vector<256x16xf32>
    %cst = arith.constant dense<0.000000e+00> : vector<16x16xf32>
    %5 = tpu.matmul %0, %4, %cst {dimension_numbers = #tpu.dot_dimension_numbers<[1], [0], [0], [1], [0, 0, 1, 1], [], []>} : vector<16x256xf32>, vector<256x16xf32>, vector<16x16xf32> -> vector<16x16xf32>
    %6 = vector.broadcast %1 : vector<1x16xf32> to vector<16x16xf32>
    %7 = arith.addf %5, %6 : vector<16x16xf32>
    %cst_5 = arith.constant 0.000000e+00 : f32
    %8 = vector.broadcast %cst_5 : f32 to vector<16x16xf32>
    %9 = arith.maximumf %7, %8 : vector<16x16xf32>
    %c0_6 = arith.constant 0 : index
    %c0_7 = arith.constant 0 : index
    %10 = vector.load %arg2[%c0_6, %c0_7] : memref<296x16xf32, #tpu.memory_space<vmem>>, vector<16x16xf32>
    %cst_8 = arith.constant dense<0.000000e+00> : vector<16x16xf32>
    %11 = tpu.matmul %9, %10, %cst_8 {dimension_numbers = #tpu.dot_dimension_numbers<[1], [0], [0], [1], [0, 0, 1, 1], [], []>} : vector<16x16xf32>, vector<16x16xf32>, vector<16x16xf32> -> vector<16x16xf32>
    %12 = vector.broadcast %2 : vector<1x16xf32> to vector<16x16xf32>
    %13 = arith.addf %11, %12 : vector<16x16xf32>
    %cst_9 = arith.constant 0.000000e+00 : f32
    %14 = vector.broadcast %cst_9 : f32 to vector<16x16xf32>
    %15 = arith.maximumf %13, %14 : vector<16x16xf32>
    %c16 = arith.constant 16 : index
    %c0_10 = arith.constant 0 : index
    %16 = vector.load %arg2[%c16, %c0_10] : memref<296x16xf32, #tpu.memory_space<vmem>>, vector<16x16xf32>
    %cst_11 = arith.constant dense<0.000000e+00> : vector<16x16xf32>
    %17 = tpu.matmul %15, %16, %cst_11 {dimension_numbers = #tpu.dot_dimension_numbers<[1], [0], [0], [1], [0, 0, 1, 1], [], []>} : vector<16x16xf32>, vector<16x16xf32>, vector<16x16xf32> -> vector<16x16xf32>
    %18 = vector.broadcast %3 : vector<1x16xf32> to vector<16x16xf32>
    %19 = arith.addf %17, %18 : vector<16x16xf32>
    %c0_12 = arith.constant 0 : index
    %c0_13 = arith.constant 0 : index
    %20 = vector.load %arg3[%c0_12, %c0_13] : memref<16x16xf32, #tpu.memory_space<vmem>>, vector<16x16xf32>
    tpu.vector_store %arg3[%c0_12, %c0_13], %19 {strides = array<i32>} : memref<16x16xf32, #tpu.memory_space<vmem>>, vector<16x16xf32>,
    return
  }
  func.func @transform_0(%arg0: i32) -> (i32, i32) {
    %c0_i32 = arith.constant 0 : i32
    %c0_i32_0 = arith.constant 0 : i32
    return %arg0, %c0_i32 : i32, i32
  }
  func.func @transform_1(%arg0: i32) -> (i32, i32) {
    %c0_i32 = arith.constant 0 : i32
    %c0_i32_0 = arith.constant 0 : i32
    %c0_i32_1 = arith.constant 0 : i32
    return %c0_i32, %c0_i32_0 : i32, i32
  }
  func.func @transform_2(%arg0: i32) -> (i32, i32) {
    %c0_i32 = arith.constant 0 : i32
    %c0_i32_0 = arith.constant 0 : i32
    return %arg0, %c0_i32 : i32, i32
  }
}

</mosaic_0001>

<bundles_post_ra>
// kernel: fcn_forward.1
= control target key start
LH: loop header
LB: loop body
LE: loop exit
PB: predicated region body
PF: predicated region fallthrough
CT: control target
= control target key end

     0   :  { %vm137_vm0 = vcmask 130048   ;;  %s537_s1 = inlined_call_operand.vmem [shape: f32[296,16], index: 1, kind: input, shape index: {}]   ;;  %s538_s0 = inlined_call_operand.vmem [shape: f32[16,256], index: 0, kind: input, shape index: {}]   ;;  %s539_s2 = inlined_call_operand.vmem [shape: f32[16,16], index: 2, kind: output, shape index: {}]  }
   0x1   :  { %v49_v0 = vld [vmem:[%s537_s1 + $0x120] sm:$0xff]  ;;  %v48_v2 = vld [vmem:[%s537_s1 + $0x118] sm:$0xff]  ;;  %v47_v4 = vld [vmem:[%s537_s1 + $0x110] sm:$0xff] }
   0x2   :  { %v33_v1 = vld [vmem:[%s537_s1 + $0xa0] sm:$0xff]  ;;  %321 = vmatprep.subr.mxu0 %v49_v0  ;;  %v32_v3 = vld [vmem:[%s537_s1 + $0x98] sm:$0xff]  ;;  %v31_v5 = vld [vmem:[%s537_s1 + $0x90] sm:$0xff] }
   0x3   :  { %322 = vmatpush3.msra.mxu0 %v33_v1  ;;  %v46_v6 = vld [vmem:[%s537_s1 + $0x108] sm:$0xff]  ;;  %v45_v8 = vld [vmem:[%s537_s1 + $0x100] sm:$0xff]  ;;  %v44_v10 = vld [vmem:[%s537_s1 + $0xf8] sm:$0xff] }
   0x4   :  { %323 = vmatprep.subr.mxu0 %v48_v2  ;;  %v30_v7 = vld [vmem:[%s537_s1 + $0x88] sm:$0xff]  ;;  %v29_v9 = vld [vmem:[%s537_s1 + $0x80] sm:$0xff]  ;;  %v28_v11 = vld [vmem:[%s537_s1 + $0x78] sm:$0xff] }
   0x5   :  { %324 = vmatpush3.msra.mxu0 %v32_v3  ;;  %v43_v12 = vld [vmem:[%s537_s1 + $0xf0] sm:$0xff]  ;;  %v12_v13 = vld [vmem:[%s538_s0 + $0x8] sm:$0xff]  ;;  %v41_v17 = vld [vmem:[%s537_s1 + $0xe0] sm:$0xff] }
   0x6   :  { %325 = vmatprep.subr.mxu0 %v47_v4  ;;  %v27_v14 = vld [vmem:[%s537_s1 + $0x70] sm:$0xff]  ;;  %118 = vmatprep.mubr.f32.mxu0 %v12_v13  ;;  %v42_v15 = vld [vmem:[%s537_s1 + $0xe8] sm:$0xff]  ;;  %v25_v18 = vld [vmem:[%s537_s1 + $0x60] sm:$0xff] }
   0x7   :  { %326 = vmatpush3.msra.mxu0 %v31_v5  ;;  %v26_v16 = vld [vmem:[%s537_s1 + $0x68] sm:$0xff]  ;;  %v40_v19 = vld [vmem:[%s537_s1 + $0xd8] sm:$0xff]  ;;  %v39_v21 = vld [vmem:[%s537_s1 + $0xd0] sm:$0xff] }
   0x8   :  { %327 = vmatprep.subr.mxu0 %v46_v6  ;;  %v24_v20 = vld [vmem:[%s537_s1 + $0x58] sm:$0xff]  ;;  %v23_v22 = vld [vmem:[%s537_s1 + $0x50] sm:$0xff]  ;;  %v38_v23 = vld [vmem:[%s537_s1 + $0xc8] sm:$0xff] }
   0x9   :  { %328 = vmatpush3.msra.mxu0 %v30_v7  ;;  %v22_v24 = vld [vmem:[%s537_s1 + $0x48] sm:$0xff]  ;;  %v37_v25 = vld [vmem:[%s537_s1 + $0xc0] sm:$0xff]  ;;  %v36_v27 = vld [vmem:[%s537_s1 + $0xb8] sm:$0xff] }
   0xa   :  { %329 = vmatprep.subr.mxu0 %v45_v8  ;;  %v21_v26 = vld [vmem:[%s537_s1 + $0x40] sm:$0xff]  ;;  %v20_v28 = vld [vmem:[%s537_s1 + $0x38] sm:$0xff]  ;;  %v35_v29 = vld [vmem:[%s537_s1 + $0xb0] sm:$0xff] }
   0xb   :  { %330 = vmatpush3.msra.mxu0 %v29_v9  ;;  %v19_v30 = vld [vmem:[%s537_s1 + $0x30] sm:$0xff]  ;;  %v34_v31 = vld [vmem:[%s537_s1 + $0xa8] sm:$0xff]  ;;  %v11_v33 = vld [vmem:[%s538_s0] sm:$0xff] }
   0xc   :  { %331 = vmatprep.subr.mxu0 %v44_v10  ;;  %v18_v32 = vld [vmem:[%s537_s1 + $0x28] sm:$0xff]  ;;  %v14_v34 = vld [vmem:[%s538_s0 + $0x18] sm:$0xff]  ;;  %v13_v35 = vld [vmem:[%s538_s0 + $0x10] sm:$0xff] }
   0xd   :  { %332 = vmatpush3.msra.mxu0 %v28_v11  ;;  %v132_v36 = vld [vmem:[%s537_s1 + $0x8] sm:$0xff]  ;;  %v131_v37 = vld [vmem:[%s537_s1] sm:$0xff]  ;;  %v222_v49 = vld [vmem:[%s537_s1 + $0x18] sm:$0xff] }
   0xe   :  { %333 = vmatprep.subr.mxu0 %v43_v12  ;;  %367 = vmatprep.subr.mxu1 %v132_v36  ;;  %v314_v40 = vld [vmem:[%s537_s1 + $0x20] ss:$0 sm:$0xff]  ;;  %v221_v50 = vld [vmem:[%s537_s1 + $0x10] sm:$0xff]  ;;  %v315_v51 = vld [vmem:[%s537_s1 + $0x21] ss:$0 sm:$0xff] }
   0xf   :  { %334 = vmatpush3.msra.mxu0 %v27_v14  ;;  %368 = vmatpush3.msra.mxu1 %v132_v36  ;;  %v318_v58 = vld [vmem:[%s537_s1 + $0x22] ss:$0 sm:$0xff] }
  0x10   :  { %335 = vmatprep.subr.mxu0 %v42_v15  ;;  %369 = vmatprep.subr.mxu1 %v131_v37 }
  0x11   :  { %336 = vmatpush3.msra.mxu0 %v26_v16  ;;  %370 = vmatpush3.msra.mxu1 %v131_v37 }
  0x12   :  { %337 = vmatprep.subr.mxu0 %v41_v17  ;;  %374 = vmatprep.subr.mxu1 %v222_v49 }
  0x13   :  { %338 = vmatpush3.msra.mxu0 %v25_v18 }
  0x14   :  { %339 = vmatprep.subr.mxu0 %v40_v19 }
  0x15   :  { %340 = vmatpush3.msra.mxu0 %v24_v20 }
  0x16   :  { %341 = vmatprep.subr.mxu0 %v39_v21 }
  0x17   :  { %342 = vmatpush3.msra.mxu0 %v23_v22 }
  0x18   :  { %343 = vmatprep.subr.mxu0 %v38_v23 }
  0x19   :  { %344 = vmatpush3.msra.mxu0 %v22_v24 }
  0x1a   :  { %345 = vmatprep.subr.mxu0 %v37_v25 }
  0x1b   :  { %346 = vmatpush3.msra.mxu0 %v21_v26 }
  0x1c   :  { %347 = vmatprep.subr.mxu0 %v36_v27 }
  0x1d   :  { %348 = vmatpush3.msra.mxu0 %v20_v28 }
  0x1e   :  { %349 = vmatprep.subr.mxu0 %v35_v29 }
  0x1f   :  { %350 = vmatpush3.msra.mxu0 %v19_v30 }
  0x20   :  { %351 = vmatprep.subr.mxu0 %v34_v31 }
  0x21   :  { %352 = vmatpush3.msra.mxu0 %v18_v32 }
  0x22   :  { %119 = vmatmul.mubr.f32.vlgmr.msra.gmra.mxu0 %v11_v33 }
  0x23   :  { %123 = vmatprep.mubr.f32.mxu0 %v14_v34 }
  0x26   :  { %124 = vmatmul.mubr.f32.gmra.mxu0 %v13_v35 }
  0xe2   :  { %v353_v38 = vpop.f32.mrf.mxu0 }
  0xe4   :  { %v354_v39 = vpop.f32.mrf.mxu0 }
  0xe5   :  { %v355_v41 = vadd.f32 %v354_v39, %v353_v38 }
  0xe6   :  { %v356_v42 = vpop.f32.mrf.mxu0 }
  0xe7   :  { %v121_v43 = vadd.f32 %v355_v41, %v314_v40 }
  0xe8   :  { %v357_v44 = vpop.f32.mrf.mxu0 }
  0xe9   :  { %v358_v45 = vadd.f32 %v357_v44, %v356_v42  ;;  %v129_v46 = vmax.f32 %v121_v43, 0.0 }
  0xeb   :  { %v126_v47 = vadd.f32 %v358_v45, %v314_v40  ;;  %371 = vmatprep.mubr.msk.f32.mxu1 %vm137_vm0, %v129_v46 }
  0xed   :  { %v130_v48 = vmax.f32 %v126_v47, 0.0 }
  0xef   :  { %372 = vmatmul.mubr.msk.f32.vlgmr.msra.gmra.mxu1 %vm137_vm0, %v130_v48 }
  0xf0   :  { %375 = vmatpush3.msra.mxu1 %v222_v49 }
  0xf1   :  { %376 = vmatprep.subr.mxu1 %v221_v50 }
  0xf2   :  { %377 = vmatpush3.msra.mxu1 %v221_v50 }
 0x1af   :  { %v373_v52 = vpop.f32.mrf.mxu1 }
 0x1b0   :  { %v216_v53 = vadd.f32 %v373_v52, %v315_v51 }
 0x1b1   :  { %v210_v54 = vpop.f32.mrf.mxu1 }
 0x1b2   :  { %v211_v55 = vadd.f32 %v315_v51, %v210_v54  ;;  %v220_v57 = vmax.f32 %v216_v53, 0.0 }
 0x1b4   :  { %v219_v56 = vmax.f32 %v211_v55, 0.0 }
 0x1b6   :  { %378 = vmatprep.mubr.msk.f32.mxu1 %vm137_vm0, %v219_v56 }
 0x1b7   :  { %379 = vmatmul.mubr.msk.f32.vlgmr.msra.gmra.mxu1 %vm137_vm0, %v220_v57 }
 0x277   :  { %v380_v59 = vpop.f32.mrf.mxu1 }
 0x278   :  { %v305_v60 = vadd.f32 %v380_v59, %v318_v58 }
 0x279   :  { %v299_v61 = vpop.f32.mrf.mxu1 }
 0x27a   :  { %309 = vst.msk [vmem:[%s539_s2 + $0x8] sm:$0xff] %vm137_vm0, %v305_v60  ;;  %v300_v62 = vadd.f32 %v318_v58, %v299_v61 }
 0x27c   :  { %308 = vst.msk [vmem:[%s539_s2] sm:$0xff] %vm137_vm0, %v300_v62 }

</bundles_post_ra>
